<compile_context>
chip_gen: v5e
topology: v5e:2x2
jax: 0.10.0
libtpu: 0.0.40
codegen_flags: <defaults>
</compile_context>

<pallas_src>
import functools

import jax
import jax.numpy as jnp
from jax.experimental import pallas as pl
from jax.experimental.pallas import tpu as pltpu


def _round_up(x, m=128):
    return ((x + m - 1) // m) * m


# ----------------------------------------------------------------------------
# Fused encoder kernel
# ----------------------------------------------------------------------------
def _encoder_kernel(
    num_node_p,               # python int Np (lane-padded), closed over
    hidden_p,                 # python int Hp (lane-padded), closed over
    x_ref,                    # (TB, Fp)   bf16 flattened + padded input tile
    w1_ref,                   # (Fp, Np)   bf16
    w2_ref,                   # (Np, Np)   bf16
    wh_ref,                   # (Np, 2Hp)  bf16  [wloc | wsc]
    bias_ref,                 # (3, W)     f32   rows: b1 | b2 | (bloc | bsc + softplus_bias)
    de_ref,                   # (TB, Np+Hp) f32  [dropout mask (pre-scaled) | epsilon]
    out_ref,                  # (TB, 3Hp)  f32   [z | z_loc | z_scale]
):
    n = num_node_p
    h = hidden_p

    bias = bias_ref[...]
    b1 = bias[0:1, :n]                       # (1, Np)   f32
    b2 = bias[1:2, :n]                       # (1, Np)   f32
    bh = bias[2:3, : 2 * h]                  # (1, 2Hp)  f32 (softplus_bias pre-folded)

    de = de_ref[...]
    drop = de[:, :n]                         # (TB, Np)  lane-aligned slice
    eps = de[:, n : n + h]                   # (TB, Hp)  lane-aligned slice

    # fc1 -> ReLU -> dropout   (bf16 MXU matmul, f32 accumulate, f32 epilogue)
    h1 = jnp.dot(x_ref[...], w1_ref[...], preferred_element_type=jnp.float32) + b1
    h1 = jnp.maximum(h1, 0.0) * drop

    # fc2
    h2 = jnp.dot(h1.astype(w2_ref.dtype), w2_ref[...],
                 preferred_element_type=jnp.float32) + b2

    # fused heads: one matmul produces [z_loc | z_logit_scale]
    heads = jnp.dot(h2.astype(wh_ref.dtype), wh_ref[...],
                    preferred_element_type=jnp.float32) + bh
    z_loc = heads[:, :h]
    z_logit = heads[:, h : 2 * h]            # softplus_bias already folded into bh

    # numerically stable softplus: log(1 + exp(x)) = max(x, 0) + log1p(exp(-|x|))
    z_scale = jnp.maximum(z_logit, 0.0) + jnp.log1p(jnp.exp(-jnp.abs(z_logit)))

    # reparameterize (Gaussian strategy): z = z_loc + z_scale * epsilon
    z = z_loc + z_scale * eps

    # three lane-aligned slice stores into the resident output slab (no concat)
    out_ref[:, :h] = z
    out_ref[:, h : 2 * h] = z_loc
    out_ref[:, 2 * h : 3 * h] = z_scale


def _pick_batch_tile(b, cap=512):
    """Batch tile selection.

    Fatter tiles amortize the ~0.35us/step grid overhead on single-TC chips
    (v5e/v6e), but keep at least two grid steps when B allows so
    dimension_semantics=("parallel",) can shard the batch across v7x's two TCs.
    """
    if b % 8 != 0:
        return b                       # small/odd batch: single full block
    tb = 8
    while tb * 2 <= min(b, cap) and b % (tb * 2) == 0:
        tb *= 2
    if tb == b and b >= 16:
        half = b // 2
        if half % 8 == 0:
            tb = half                  # guarantee >= 2 grid steps (v7x megacore)
    return tb


def _call_kernel(kernel, x, w1, w2, wh, bias, drop_eps, *, b, tb, fp, np_, hp,
                 w_bias, cost, vmem_limit, single_buffer_weights):
    """Builds and runs the pallas_call.  `single_buffer_weights` requests
    pipeline_mode=pl.Buffered(1) on the grid-invariant operands."""
    wkw = {"pipeline_mode": pl.Buffered(1)} if single_buffer_weights else {}
    in_specs = [
        pl.BlockSpec((tb, fp), lambda i: (i, 0)),                 # x (streamed)
        pl.BlockSpec((fp, np_), lambda i: (0, 0), **wkw),         # w1 (resident)
        pl.BlockSpec((np_, np_), lambda i: (0, 0), **wkw),        # w2 (resident)
        pl.BlockSpec((np_, 2 * hp), lambda i: (0, 0), **wkw),     # w_heads (resident)
        pl.BlockSpec((3, w_bias), lambda i: (0, 0), **wkw),       # packed biases
        pl.BlockSpec((tb, np_ + hp), lambda i: (i, 0)),           # dropout|eps (streamed)
    ]
    return pl.pallas_call(
        kernel,
        out_shape=jax.ShapeDtypeStruct((b, 3 * hp), jnp.float32),
        grid=(b // tb,),
        in_specs=in_specs,
        out_specs=pl.BlockSpec((tb, 3 * hp), lambda i: (i, 0)),
        compiler_params=pltpu.CompilerParams(
            dimension_semantics=("parallel",),
            vmem_limit_bytes=vmem_limit,
        ),
        cost_estimate=cost,
    )(x, w1, w2, wh, bias, drop_eps)


def encoder_forward(packed, sequence, dropout_mask, epsilon, num_node, hidden_dim):
    """Runs the fused Pallas encoder kernel.

    packed:       dict from pack_params (padded bf16 weights, f32 bias, dims)
    sequence:     (B, seq_len, input_dim) float32
    dropout_mask: (B, num_node) float32  -- already scaled (mask / keep_prob)
    epsilon:      (B, hidden_dim) float32
    Returns (z, (z_loc, z_scale)) matching the PyTorch module (Gaussian strategy).
    """
    b = sequence.shape[0]
    fp, np_, hp, w_bias = packed["dims"]

    # nn.Flatten + lane padding + bf16 cast for the MXU stream
    x = sequence.reshape(b, -1).astype(jnp.float32)
    f = x.shape[1]
    x = jnp.pad(x, ((0, 0), (0, fp - f))).astype(jnp.bfloat16)

    # pack dropout mask and epsilon into one lane-aligned operand (B, Np+Hp)
    drop = jnp.pad(dropout_mask.astype(jnp.float32), ((0, 0), (0, np_ - num_node)))
    eps = jnp.pad(epsilon.astype(jnp.float32), ((0, 0), (0, hp - hidden_dim)))
    drop_eps = jnp.concatenate([drop, eps], axis=-1)

    tb = _pick_batch_tile(b)

    kernel = functools.partial(_encoder_kernel, np_, hp)

    cost = pl.CostEstimate(
        flops=2 * b * (fp * np_ + np_ * np_ + np_ * 2 * hp),
        transcendentals=2 * b * hp,                        # exp + log1p per element
        bytes_accessed=(
            2 * (b * fp + fp * np_ + np_ * np_ + np_ * 2 * hp)   # bf16 streams/weights
            + 4 * (3 * w_bias + b * (np_ + hp) + b * 3 * hp)      # f32 bias/mask/out
        ),
    )

    # VMEM plan: resident weights (x2 to cover the double-buffered fallback),
    # double-buffered streamed tiles, intermediates, plus headroom; clamp to the
    # v7x per-TC physical budget.
    weight_bytes = 2 * (fp * np_ + np_ * np_ + np_ * 2 * hp) + 4 * 3 * w_bias
    tile_bytes = 2 * tb * fp + 4 * tb * (np_ + hp) + 4 * tb * 3 * hp
    interm_bytes = 4 * tb * (2 * np_ + 5 * hp) * 2
    vmem_limit = int(min(64 * 1024 * 1024,
                         2 * weight_bytes + 2 * tile_bytes + interm_bytes + (4 << 20)))

    common = dict(b=b, tb=tb, fp=fp, np_=np_, hp=hp, w_bias=w_bias,
                  cost=cost, vmem_limit=vmem_limit)
    try:
        out = _call_kernel(kernel, x, packed["w1"], packed["w2"], packed["wh"],
                           packed["bias"], drop_eps,
                           single_buffer_weights=True, **common)
    except Exception:
        # pipeline_mode=pl.Buffered(1) unsupported on this jax/Mosaic build:
        # fall back to default double-buffered specs (weights are tiny in bf16).
        out = _call_kernel(kernel, x, packed["w1"], packed["w2"], packed["wh"],
                           packed["bias"], drop_eps,
                           single_buffer_weights=False, **common)

    z = out[:, :hidden_dim]
    z_loc = out[:, hp : hp + hidden_dim]
    z_scale = out[:, 2 * hp : 2 * hp + hidden_dim]
    return z, (z_loc, z_scale)


# ----------------------------------------------------------------------------
# Deterministic parameter construction (synthetic init, no checkpoint) + packing
# ----------------------------------------------------------------------------
def init_params(key, seq_len, input_dim, hidden_dim, num_node):
    f = seq_len * input_dim
    ks = jax.random.split(key, 8)

    def u(k, shape, fan_in):
        bound = 1.0 / jnp.sqrt(fan_in)
        return jax.random.uniform(k, shape, jnp.float32, -bound, bound)

    return {
        # weights stored as (in_features, out_features) == PyTorch weight.T
        "w1": u(ks[0], (f, num_node), f),
        "b1": u(ks[1], (num_node,), f),
        "w2": u(ks[2], (num_node, num_node), num_node),
        "b2": u(ks[3], (num_node,), num_node),
        "wloc": u(ks[4], (num_node, hidden_dim), num_node),
        "bloc": u(ks[5], (hidden_dim,), num_node),
        "wsc": u(ks[6], (num_node, hidden_dim), num_node),
        "bsc": u(ks[7], (hidden_dim,), num_node),
    }


def pack_params(p, seq_len, input_dim, num_node, hidden_dim, softplus_bias):
    """Zero-pads all lane dims to multiples of 128, fuses the head weights,
    folds softplus_bias into the scale-head bias, and casts weights to bf16."""
    f = seq_len * input_dim
    fp, np_, hp = _round_up(f), _round_up(num_node), _round_up(hidden_dim)
    w_bias = max(np_, 2 * hp)

    w1 = jnp.zeros((fp, np_), jnp.float32).at[:f, :num_node].set(p["w1"])
    w2 = jnp.zeros((np_, np_), jnp.float32).at[:num_node, :num_node].set(p["w2"])
    wh = jnp.zeros((np_, 2 * hp), jnp.float32)
    wh = wh.at[:num_node, :hidden_dim].set(p["wloc"])
    wh = wh.at[:num_node, hp : hp + hidden_dim].set(p["wsc"])

    bias = jnp.zeros((3, w_bias), jnp.float32)
    bias = bias.at[0, :num_node].set(p["b1"])
    bias = bias.at[1, :num_node].set(p["b2"])
    bias = bias.at[2, :hidden_dim].set(p["bloc"])
    # fold the softplus shift into the packed scale-head bias row
    bias = bias.at[2, hp : hp + hidden_dim].set(p["bsc"] + softplus_bias)

    return {
        "w1": w1.astype(jnp.bfloat16),
        "w2": w2.astype(jnp.bfloat16),
        "wh": wh.astype(jnp.bfloat16),
        "bias": bias,                                # f32: bias adds stay in f32
        "dims": (fp, np_, hp, w_bias),
    }


# ----------------------------------------------------------------------------
# Pure-JAX reference (mirrors the PyTorch forward; matmuls in bf16 with f32
# accumulation, matching the kernel's deliberate precision choice so the
# comparison can stay tight).
# ----------------------------------------------------------------------------
def encoder_reference(p, sequence, dropout_mask, epsilon, softplus_bias):
    b = sequence.shape[0]
    bf = jnp.bfloat16
    x = sequence.reshape(b, -1)
    h1 = jnp.dot(x.astype(bf), p["w1"].astype(bf),
                 preferred_element_type=jnp.float32) + p["b1"]
    h1 = jnp.maximum(h1, 0.0) * dropout_mask
    h2 = jnp.dot(h1.astype(bf), p["w2"].astype(bf),
                 preferred_element_type=jnp.float32) + p["b2"]
    z_loc = jnp.dot(h2.astype(bf), p["wloc"].astype(bf),
                    preferred_element_type=jnp.float32) + p["bloc"]
    z_logit = jnp.dot(h2.astype(bf), p["wsc"].astype(bf),
                      preferred_element_type=jnp.float32) + p["bsc"] + softplus_bias
    z_scale = jnp.maximum(z_logit, 0.0) + jnp.log1p(jnp.exp(-jnp.abs(z_logit)))
    return z_loc + z_scale * epsilon, (z_loc, z_scale)


if __name__ == "__main__":
    # Small shapes consistent with the module's forward.
    B, SEQ_LEN, INPUT_DIM, HIDDEN_DIM, NUM_NODE = 2, 8, 4, 16, 32
    STRATEGY = "Gaussian"
    BIAS = {"Gaussian": -2.0}           # softplus shift hyperparameter
    DROPOUT_P = 0.5

    root = jax.random.PRNGKey(0)
    k_param, k_x, k_drop, k_eps = jax.random.split(root, 4)

    params = init_params(k_param, SEQ_LEN, INPUT_DIM, HIDDEN_DIM, NUM_NODE)
    packed = pack_params(params, SEQ_LEN, INPUT_DIM, NUM_NODE, HIDDEN_DIM,
                         BIAS[STRATEGY])
    sequence = jax.random.normal(k_x, (B, SEQ_LEN, INPUT_DIM), jnp.float32)

    # Train-mode dropout mask (Bernoulli keep / (1 - p)); pass all-ones for eval.
    keep = jax.random.bernoulli(k_drop, 1.0 - DROPOUT_P, (B, NUM_NODE))
    dropout_mask = keep.astype(jnp.float32) / (1.0 - DROPOUT_P)

    # Gaussian reparameterization noise (strategy == 'Gaussian').
    epsilon = jax.random.normal(k_eps, (B, HIDDEN_DIM), jnp.float32)

    z, (z_loc, z_scale) = encoder_forward(
        packed, sequence, dropout_mask, epsilon, NUM_NODE, HIDDEN_DIM,
    )
    jax.block_until_ready((z, z_loc, z_scale))

    # correctness check against the matched-precision pure-JAX reference
    z_r, (zl_r, zs_r) = encoder_reference(
        params, sequence, dropout_mask, epsilon, BIAS[STRATEGY]
    )
    assert z.shape == (B, HIDDEN_DIM)
    assert z_loc.shape == (B, HIDDEN_DIM)
    assert z_scale.shape == (B, HIDDEN_DIM)
    assert bool(jnp.all(z_scale > 0.0))
    assert bool(jnp.allclose(z, z_r, atol=1e-4, rtol=1e-4))
    assert bool(jnp.allclose(z_loc, zl_r, atol=1e-4, rtol=1e-4))
    assert bool(jnp.allclose(z_scale, zs_r, atol=1e-4, rtol=1e-4))
    print("KERNEL_OK")
</pallas_src>

<mosaic_0001>
module attributes {stable_mosaic.version = 11 : i64} {
  func.func @_encoder_kernel(%arg0: i32, %arg1: memref<2x128xbf16, #tpu.memory_space<vmem>>, %arg2: memref<128x128xbf16, #tpu.memory_space<vmem>>, %arg3: memref<128x128xbf16, #tpu.memory_space<vmem>>, %arg4: memref<128x256xbf16, #tpu.memory_space<vmem>>, %arg5: memref<3x256xf32, #tpu.memory_space<vmem>>, %arg6: memref<2x256xf32, #tpu.memory_space<vmem>>, %arg7: memref<2x384xf32, #tpu.memory_space<vmem>>) attributes {dimension_semantics = [#tpu.dimension_semantics<parallel>], iteration_bounds = array<i64: 1>, scalar_prefetch = 0 : i64, scratch_operands = 0 : i64, tpu.core_type = #tpu.core_type<tc>, window_params = [{transform_indices = @transform_0, window_bounds = array<i64: 2, 128>}, {pipeline_mode = #tpu.pipeline_mode<synchronous>, transform_indices = @transform_1, window_bounds = array<i64: 128, 128>}, {pipeline_mode = #tpu.pipeline_mode<synchronous>, transform_indices = @transform_2, window_bounds = array<i64: 128, 128>}, {pipeline_mode = #tpu.pipeline_mode<synchronous>, transform_indices = @transform_3, window_bounds = array<i64: 128, 256>}, {pipeline_mode = #tpu.pipeline_mode<synchronous>, transform_indices = @transform_4, window_bounds = array<i64: 3, 256>}, {transform_indices = @transform_5, window_bounds = array<i64: 2, 256>}, {transform_indices = @transform_6, window_bounds = array<i64: 2, 384>}]} {
    %c0 = arith.constant 0 : index
    %c0_0 = arith.constant 0 : index
    %0 = vector.load %arg5[%c0, %c0_0] : memref<3x256xf32, #tpu.memory_space<vmem>>, vector<3x256xf32>
    %1 = vector.extract_strided_slice %0 {offsets = [0, 0], sizes = [1, 128], strides = [1, 1]} : vector<3x256xf32> to vector<1x128xf32>
    %2 = vector.extract_strided_slice %0 {offsets = [1, 0], sizes = [1, 128], strides = [1, 1]} : vector<3x256xf32> to vector<1x128xf32>
    %3 = vector.extract_strided_slice %0 {offsets = [2, 0], sizes = [1, 256], strides = [1, 1]} : vector<3x256xf32> to vector<1x256xf32>
    %c0_1 = arith.constant 0 : index
    %c0_2 = arith.constant 0 : index
    %4 = vector.load %arg6[%c0_1, %c0_2] : memref<2x256xf32, #tpu.memory_space<vmem>>, vector<2x256xf32>
    %5 = vector.extract_strided_slice %4 {offsets = [0, 0], sizes = [2, 128], strides = [1, 1]} : vector<2x256xf32> to vector<2x128xf32>
    %6 = vector.extract_strided_slice %4 {offsets = [0, 128], sizes = [2, 128], strides = [1, 1]} : vector<2x256xf32> to vector<2x128xf32>
    %c0_3 = arith.constant 0 : index
    %c0_4 = arith.constant 0 : index
    %7 = vector.load %arg1[%c0_3, %c0_4] : memref<2x128xbf16, #tpu.memory_space<vmem>>, vector<2x128xbf16>
    %c0_5 = arith.constant 0 : index
    %c0_6 = arith.constant 0 : index
    %8 = vector.load %arg2[%c0_5, %c0_6] : memref<128x128xbf16, #tpu.memory_space<vmem>>, vector<128x128xbf16>
    %cst = arith.constant dense<0.000000e+00> : vector<2x128xf32>
    %9 = tpu.matmul %7, %8, %cst {dimension_numbers = #tpu.dot_dimension_numbers<[1], [0], [0], [1], [0, 0, 1, 1], [], []>} : vector<2x128xbf16>, vector<128x128xbf16>, vector<2x128xf32> -> vector<2x128xf32>
    %10 = vector.broadcast %1 : vector<1x128xf32> to vector<2x128xf32>
    %11 = arith.addf %9, %10 : vector<2x128xf32>
    %cst_7 = arith.constant 0.000000e+00 : f32
    %12 = vector.broadcast %cst_7 : f32 to vector<2x128xf32>
    %13 = arith.maximumf %11, %12 : vector<2x128xf32>
    %14 = arith.mulf %13, %5 : vector<2x128xf32>
    %15 = arith.truncf %14 : vector<2x128xf32> to vector<2x128xbf16>
    %c0_8 = arith.constant 0 : index
    %c0_9 = arith.constant 0 : index
    %16 = vector.load %arg3[%c0_8, %c0_9] : memref<128x128xbf16, #tpu.memory_space<vmem>>, vector<128x128xbf16>
    %cst_10 = arith.constant dense<0.000000e+00> : vector<2x128xf32>
    %17 = tpu.matmul %15, %16, %cst_10 {dimension_numbers = #tpu.dot_dimension_numbers<[1], [0], [0], [1], [0, 0, 1, 1], [], []>} : vector<2x128xbf16>, vector<128x128xbf16>, vector<2x128xf32> -> vector<2x128xf32>
    %18 = vector.broadcast %2 : vector<1x128xf32> to vector<2x128xf32>
    %19 = arith.addf %17, %18 : vector<2x128xf32>
    %20 = arith.truncf %19 : vector<2x128xf32> to vector<2x128xbf16>
    %c0_11 = arith.constant 0 : index
    %c0_12 = arith.constant 0 : index
    %21 = vector.load %arg4[%c0_11, %c0_12] : memref<128x256xbf16, #tpu.memory_space<vmem>>, vector<128x256xbf16>
    %cst_13 = arith.constant dense<0.000000e+00> : vector<2x256xf32>
    %22 = tpu.matmul %20, %21, %cst_13 {dimension_numbers = #tpu.dot_dimension_numbers<[1], [0], [0], [1], [0, 0, 1, 1], [], []>} : vector<2x128xbf16>, vector<128x256xbf16>, vector<2x256xf32> -> vector<2x256xf32>
    %23 = vector.broadcast %3 : vector<1x256xf32> to vector<2x256xf32>
    %24 = arith.addf %22, %23 : vector<2x256xf32>
    %25 = vector.extract_strided_slice %24 {offsets = [0, 0], sizes = [2, 128], strides = [1, 1]} : vector<2x256xf32> to vector<2x128xf32>
    %26 = vector.extract_strided_slice %24 {offsets = [0, 128], sizes = [2, 128], strides = [1, 1]} : vector<2x256xf32> to vector<2x128xf32>
    %cst_14 = arith.constant 0.000000e+00 : f32
    %27 = vector.broadcast %cst_14 : f32 to vector<2x128xf32>
    %28 = arith.maximumf %26, %27 : vector<2x128xf32>
    %29 = math.absf %26 : vector<2x128xf32>
    %cst_15 = arith.constant 0.000000e+00 : f32
    %30 = vector.broadcast %cst_15 : f32 to vector<2x128xf32>
    %31 = arith.subf %30, %29 : vector<2x128xf32>
    %32 = math.exp %31 : vector<2x128xf32>
    %33 = math.log1p %32 : vector<2x128xf32>
    %34 = arith.addf %28, %33 : vector<2x128xf32>
    %35 = arith.mulf %34, %6 : vector<2x128xf32>
    %36 = arith.addf %25, %35 : vector<2x128xf32>
    %c0_16 = arith.constant 0 : index
    %c0_17 = arith.constant 0 : index
    %37 = vector.load %arg7[%c0_16, %c0_17] : memref<2x384xf32, #tpu.memory_space<vmem>>, vector<2x128xf32>
    tpu.vector_store %arg7[%c0_16, %c0_17], %36 {strides = array<i32>} : memref<2x384xf32, #tpu.memory_space<vmem>>, vector<2x128xf32>,
    %c0_18 = arith.constant 0 : index
    %c128 = arith.constant 128 : index
    %38 = vector.load %arg7[%c0_18, %c128] : memref<2x384xf32, #tpu.memory_space<vmem>>, vector<2x128xf32>
    tpu.vector_store %arg7[%c0_18, %c128], %25 {strides = array<i32>} : memref<2x384xf32, #tpu.memory_space<vmem>>, vector<2x128xf32>,
    %c0_19 = arith.constant 0 : index
    %c256 = arith.constant 256 : index
    %39 = vector.load %arg7[%c0_19, %c256] : memref<2x384xf32, #tpu.memory_space<vmem>>, vector<2x128xf32>
    tpu.vector_store %arg7[%c0_19, %c256], %34 {strides = array<i32>} : memref<2x384xf32, #tpu.memory_space<vmem>>, vector<2x128xf32>,
    return
  }
  func.func @transform_0(%arg0: i32) -> (i32, i32) {
    %c0_i32 = arith.constant 0 : i32
    %c0_i32_0 = arith.constant 0 : i32
    return %arg0, %c0_i32 : i32, i32
  }
  func.func @transform_1(%arg0: i32) -> (i32, i32) {
    %c0_i32 = arith.constant 0 : i32
    %c0_i32_0 = arith.constant 0 : i32
    %c0_i32_1 = arith.constant 0 : i32
    return %c0_i32, %c0_i32_0 : i32, i32
  }
  func.func @transform_2(%arg0: i32) -> (i32, i32) {
    %c0_i32 = arith.constant 0 : i32
    %c0_i32_0 = arith.constant 0 : i32
    %c0_i32_1 = arith.constant 0 : i32
    return %c0_i32, %c0_i32_0 : i32, i32
  }
  func.func @transform_3(%arg0: i32) -> (i32, i32) {
    %c0_i32 = arith.constant 0 : i32
    %c0_i32_0 = arith.constant 0 : i32
    %c0_i32_1 = arith.constant 0 : i32
    return %c0_i32, %c0_i32_0 : i32, i32
  }
  func.func @transform_4(%arg0: i32) -> (i32, i32) {
    %c0_i32 = arith.constant 0 : i32
    %c0_i32_0 = arith.constant 0 : i32
    %c0_i32_1 = arith.constant 0 : i32
    return %c0_i32, %c0_i32_0 : i32, i32
  }
  func.func @transform_5(%arg0: i32) -> (i32, i32) {
    %c0_i32 = arith.constant 0 : i32
    %c0_i32_0 = arith.constant 0 : i32
    return %arg0, %c0_i32 : i32, i32
  }
  func.func @transform_6(%arg0: i32) -> (i32, i32) {
    %c0_i32 = arith.constant 0 : i32
    %c0_i32_0 = arith.constant 0 : i32
    return %arg0, %c0_i32 : i32, i32
  }
}

module attributes {stable_mosaic.version = 11 : i64} {
  func.func @_encoder_kernel(%arg0: i32, %arg1: memref<2x128xbf16, #tpu.memory_space<vmem>>, %arg2: memref<128x128xbf16, #tpu.memory_space<vmem>>, %arg3: memref<128x128xbf16, #tpu.memory_space<vmem>>, %arg4: memref<128x256xbf16, #tpu.memory_space<vmem>>, %arg5: memref<3x256xf32, #tpu.memory_space<vmem>>, %arg6: memref<2x256xf32, #tpu.memory_space<vmem>>, %arg7: memref<2x384xf32, #tpu.memory_space<vmem>>) attributes {dimension_semantics = [#tpu.dimension_semantics<parallel>], iteration_bounds = array<i64: 1>, scalar_prefetch = 0 : i64, scratch_operands = 0 : i64, tpu.core_type = #tpu.core_type<tc>, window_params = [{transform_indices = @transform_0, window_bounds = array<i64: 2, 128>}, {pipeline_mode = #tpu.pipeline_mode<synchronous>, transform_indices = @transform_1, window_bounds = array<i64: 128, 128>}, {pipeline_mode = #tpu.pipeline_mode<synchronous>, transform_indices = @transform_2, window_bounds = array<i64: 128, 128>}, {pipeline_mode = #tpu.pipeline_mode<synchronous>, transform_indices = @transform_3, window_bounds = array<i64: 128, 256>}, {pipeline_mode = #tpu.pipeline_mode<synchronous>, transform_indices = @transform_4, window_bounds = array<i64: 3, 256>}, {transform_indices = @transform_5, window_bounds = array<i64: 2, 256>}, {transform_indices = @transform_6, window_bounds = array<i64: 2, 384>}]} {
    %c0 = arith.constant 0 : index
    %c0_0 = arith.constant 0 : index
    %0 = vector.load %arg5[%c0, %c0_0] : memref<3x256xf32, #tpu.memory_space<vmem>>, vector<3x256xf32>
    %1 = vector.extract_strided_slice %0 {offsets = [0, 0], sizes = [1, 128], strides = [1, 1]} : vector<3x256xf32> to vector<1x128xf32>
    %2 = vector.extract_strided_slice %0 {offsets = [1, 0], sizes = [1, 128], strides = [1, 1]} : vector<3x256xf32> to vector<1x128xf32>
    %3 = vector.extract_strided_slice %0 {offsets = [2, 0], sizes = [1, 256], strides = [1, 1]} : vector<3x256xf32> to vector<1x256xf32>
    %c0_1 = arith.constant 0 : index
    %c0_2 = arith.constant 0 : index
    %4 = vector.load %arg6[%c0_1, %c0_2] : memref<2x256xf32, #tpu.memory_space<vmem>>, vector<2x256xf32>
    %5 = vector.extract_strided_slice %4 {offsets = [0, 0], sizes = [2, 128], strides = [1, 1]} : vector<2x256xf32> to vector<2x128xf32>
    %6 = vector.extract_strided_slice %4 {offsets = [0, 128], sizes = [2, 128], strides = [1, 1]} : vector<2x256xf32> to vector<2x128xf32>
    %c0_3 = arith.constant 0 : index
    %c0_4 = arith.constant 0 : index
    %7 = vector.load %arg1[%c0_3, %c0_4] : memref<2x128xbf16, #tpu.memory_space<vmem>>, vector<2x128xbf16>
    %c0_5 = arith.constant 0 : index
    %c0_6 = arith.constant 0 : index
    %8 = vector.load %arg2[%c0_5, %c0_6] : memref<128x128xbf16, #tpu.memory_space<vmem>>, vector<128x128xbf16>
    %cst = arith.constant dense<0.000000e+00> : vector<2x128xf32>
    %9 = tpu.matmul %7, %8, %cst {dimension_numbers = #tpu.dot_dimension_numbers<[1], [0], [0], [1], [0, 0, 1, 1], [], []>} : vector<2x128xbf16>, vector<128x128xbf16>, vector<2x128xf32> -> vector<2x128xf32>
    %10 = vector.broadcast %1 : vector<1x128xf32> to vector<2x128xf32>
    %11 = arith.addf %9, %10 : vector<2x128xf32>
    %cst_7 = arith.constant 0.000000e+00 : f32
    %12 = vector.broadcast %cst_7 : f32 to vector<2x128xf32>
    %13 = arith.maximumf %11, %12 : vector<2x128xf32>
    %14 = arith.mulf %13, %5 : vector<2x128xf32>
    %15 = arith.truncf %14 : vector<2x128xf32> to vector<2x128xbf16>
    %c0_8 = arith.constant 0 : index
    %c0_9 = arith.constant 0 : index
    %16 = vector.load %arg3[%c0_8, %c0_9] : memref<128x128xbf16, #tpu.memory_space<vmem>>, vector<128x128xbf16>
    %cst_10 = arith.constant dense<0.000000e+00> : vector<2x128xf32>
    %17 = tpu.matmul %15, %16, %cst_10 {dimension_numbers = #tpu.dot_dimension_numbers<[1], [0], [0], [1], [0, 0, 1, 1], [], []>} : vector<2x128xbf16>, vector<128x128xbf16>, vector<2x128xf32> -> vector<2x128xf32>
    %18 = vector.broadcast %2 : vector<1x128xf32> to vector<2x128xf32>
    %19 = arith.addf %17, %18 : vector<2x128xf32>
    %20 = arith.truncf %19 : vector<2x128xf32> to vector<2x128xbf16>
    %c0_11 = arith.constant 0 : index
    %c0_12 = arith.constant 0 : index
    %21 = vector.load %arg4[%c0_11, %c0_12] : memref<128x256xbf16, #tpu.memory_space<vmem>>, vector<128x256xbf16>
    %cst_13 = arith.constant dense<0.000000e+00> : vector<2x256xf32>
    %22 = tpu.matmul %20, %21, %cst_13 {dimension_numbers = #tpu.dot_dimension_numbers<[1], [0], [0], [1], [0, 0, 1, 1], [], []>} : vector<2x128xbf16>, vector<128x256xbf16>, vector<2x256xf32> -> vector<2x256xf32>
    %23 = vector.broadcast %3 : vector<1x256xf32> to vector<2x256xf32>
    %24 = arith.addf %22, %23 : vector<2x256xf32>
    %25 = vector.extract_strided_slice %24 {offsets = [0, 0], sizes = [2, 128], strides = [1, 1]} : vector<2x256xf32> to vector<2x128xf32>
    %26 = vector.extract_strided_slice %24 {offsets = [0, 128], sizes = [2, 128], strides = [1, 1]} : vector<2x256xf32> to vector<2x128xf32>
    %cst_14 = arith.constant 0.000000e+00 : f32
    %27 = vector.broadcast %cst_14 : f32 to vector<2x128xf32>
    %28 = arith.maximumf %26, %27 : vector<2x128xf32>
    %29 = math.absf %26 : vector<2x128xf32>
    %cst_15 = arith.constant 0.000000e+00 : f32
    %30 = vector.broadcast %cst_15 : f32 to vector<2x128xf32>
    %31 = arith.subf %30, %29 : vector<2x128xf32>
    %32 = math.exp %31 : vector<2x128xf32>
    %33 = math.log1p %32 : vector<2x128xf32>
    %34 = arith.addf %28, %33 : vector<2x128xf32>
    %35 = arith.mulf %34, %6 : vector<2x128xf32>
    %36 = arith.addf %25, %35 : vector<2x128xf32>
    %c0_16 = arith.constant 0 : index
    %c0_17 = arith.constant 0 : index
    %37 = vector.load %arg7[%c0_16, %c0_17] : memref<2x384xf32, #tpu.memory_space<vmem>>, vector<2x128xf32>
    tpu.vector_store %arg7[%c0_16, %c0_17], %36 {strides = array<i32>} : memref<2x384xf32, #tpu.memory_space<vmem>>, vector<2x128xf32>,
    %c0_18 = arith.constant 0 : index
    %c128 = arith.constant 128 : index
    %38 = vector.load %arg7[%c0_18, %c128] : memref<2x384xf32, #tpu.memory_space<vmem>>, vector<2x128xf32>
    tpu.vector_store %arg7[%c0_18, %c128], %25 {strides = array<i32>} : memref<2x384xf32, #tpu.memory_space<vmem>>, vector<2x128xf32>,
    %c0_19 = arith.constant 0 : index
    %c256 = arith.constant 256 : index
    %39 = vector.load %arg7[%c0_19, %c256] : memref<2x384xf32, #tpu.memory_space<vmem>>, vector<2x128xf32>
    tpu.vector_store %arg7[%c0_19, %c256], %34 {strides = array<i32>} : memref<2x384xf32, #tpu.memory_space<vmem>>, vector<2x128xf32>,
    return
  }
  func.func @transform_0(%arg0: i32) -> (i32, i32) {
    %c0_i32 = arith.constant 0 : i32
    %c0_i32_0 = arith.constant 0 : i32
    return %arg0, %c0_i32 : i32, i32
  }
  func.func @transform_1(%arg0: i32) -> (i32, i32) {
    %c0_i32 = arith.constant 0 : i32
    %c0_i32_0 = arith.constant 0 : i32
    %c0_i32_1 = arith.constant 0 : i32
    return %c0_i32, %c0_i32_0 : i32, i32
  }
  func.func @transform_2(%arg0: i32) -> (i32, i32) {
    %c0_i32 = arith.constant 0 : i32
    %c0_i32_0 = arith.constant 0 : i32
    %c0_i32_1 = arith.constant 0 : i32
    return %c0_i32, %c0_i32_0 : i32, i32
  }
  func.func @transform_3(%arg0: i32) -> (i32, i32) {
    %c0_i32 = arith.constant 0 : i32
    %c0_i32_0 = arith.constant 0 : i32
    %c0_i32_1 = arith.constant 0 : i32
    return %c0_i32, %c0_i32_0 : i32, i32
  }
  func.func @transform_4(%arg0: i32) -> (i32, i32) {
    %c0_i32 = arith.constant 0 : i32
    %c0_i32_0 = arith.constant 0 : i32
    %c0_i32_1 = arith.constant 0 : i32
    return %c0_i32, %c0_i32_0 : i32, i32
  }
  func.func @transform_5(%arg0: i32) -> (i32, i32) {
    %c0_i32 = arith.constant 0 : i32
    %c0_i32_0 = arith.constant 0 : i32
    return %arg0, %c0_i32 : i32, i32
  }
  func.func @transform_6(%arg0: i32) -> (i32, i32) {
    %c0_i32 = arith.constant 0 : i32
    %c0_i32_0 = arith.constant 0 : i32
    return %arg0, %c0_i32 : i32, i32
  }
}

</mosaic_0001>

<bundles_post_ra>
// kernel: tpu_custom_call.1
= control target key start
LH: loop header
LB: loop body
LE: loop exit
PB: predicated region body
PF: predicated region fallthrough
CT: control target
= control target key end

     0   :  { %11 = vsyncpa [#allocation3], 0  ;;  %s829_s0 = inlined_call_operand.hbm [shape: bf16[2,128], index: 0, kind: input, shape index: {}]   ;;  %s830_s1 = inlined_call_operand.hbm [shape: bf16[128,128], index: 1, kind: input, shape index: {}]   ;;  %s831_s2 = inlined_call_operand.hbm [shape: bf16[128,128], index: 2, kind: input, shape index: {}]   ;;  %s832_s3 = inlined_call_operand.hbm [shape: bf16[128,256], index: 3, kind: input, shape index: {}]   ;;  %s833_s4 = inlined_call_operand.hbm [shape: f32[3,256], index: 4, kind: input, shape index: {}]   ;;  %s834_s5 = inlined_call_operand.vmem [shape: f32[2,256], index: 5, kind: input, shape index: {}]   ;;  %s835_s6 = inlined_call_operand.hbm [shape: f32[2,384], index: 6, kind: output, shape index: {}]  }
   0x1   :  { %12 = vsyncpa [#allocation6], 0 }
   0x2   :  { %13 = vsyncpa [#allocation9], 0  ;;  %s30_s23 = sshll.u32 %s830_s1, 4  ;;  %s31_s23 = int_to_ptr.hbm [resolvable:$true] %s30_s23 }
   0x3   :  { %14 = vsyncpa [#allocation4], 0  ;;  %s759_s24 = smov [#allocation5]   ;;  %s56_s28 = sshll.u32 %s832_s3, 4  ;;  %s57_s28 = int_to_ptr.hbm [resolvable:$true] %s56_s28 }
   0x4   :  { %s32_s25 = sshll.u32 %s759_s24, 4  ;;  %s760_s29 = smov 64   ;;  %s33_s25 = int_to_ptr.vmem [resolvable:$true] %s32_s25 }
   0x5   :  { %s761_s30 = smov 4   ;;  %s762_s7 = smov [#allocation8]  }
   0x6   :  { %38 = dma.hbm_to_vmem [thread:$0]  %s31_s23, 1024, %s33_s25, [#allocation6], %s760_s29, %s760_s29, %s761_s30  }
   0x7   :  { %s58_s8 = sshll.u32 %s762_s7, 4  ;;  %s763_s9 = smov 128   ;;  %s59_s8 = int_to_ptr.vmem [resolvable:$true] %s58_s8 }
   0x8   :  { %s764_s10 = smov 8   ;;  %s20_s12 = sshll.u32 %s829_s0, 4  ;;  %s21_s12 = int_to_ptr.hbm [resolvable:$true] %s20_s12 }
   0x9   :  { %64 = dma.hbm_to_vmem [thread:$0]  %s57_s28, 2048, %s59_s8, [#allocation9], %s763_s9, %s763_s9, %s764_s10  }
   0xa   :  { %s765_s13 = smov [#allocation2]   ;;  %s43_s16 = sshll.u32 %s831_s2, 4  ;;  %s44_s16 = int_to_ptr.hbm [resolvable:$true] %s43_s16 }
   0xb   :  { %s22_s14 = sshll.u32 %s765_s13, 4  ;;  %s766_s17 = smov [#allocation7]   ;;  %s23_s14 = int_to_ptr.vmem [resolvable:$true] %s22_s14 }
   0xc   :  { %25 = dma.hbm_to_vmem [thread:$0]  %s21_s12, 16, %s23_s14, [#allocation3]  }
   0xd   :  { %s45_s18 = sshll.u32 %s766_s17, 4  ;;  %s70_s21 = sshll.u32 %s833_s4, 4  ;;  %s46_s18 = int_to_ptr.vmem [resolvable:$true] %s45_s18  ;;  %s71_s21 = int_to_ptr.hbm [resolvable:$true] %s70_s21 }
   0xe   :  { %51 = dma.hbm_to_vmem [thread:$0]  %s44_s16, 1024, %s46_s18, [#allocation6], %s760_s29, %s760_s29, %s761_s30  }
   0xf   :  { %s767_s0 = smov [#allocation10]  }
  0x10   :  { %s72_s22 = sshll.u32 %s767_s0, 4  ;;  %s73_s22 = int_to_ptr.vmem [resolvable:$true] %s72_s22 }
  0x11   :  { %75 = dma.hbm_to_vmem [thread:$0]  %s71_s21, 128, %s73_s22, [#allocation9]  }
  0x12   :  { %751 = dma.done.wait [#allocation3], 16  }
  0x13   :  { %752 = vsyncadd [#allocation3], 4294967280 }
  0x14   :  { %753 = dma.done.wait [#allocation6], 2048  }
  0x15   :  { %754 = vsyncadd [#allocation6], 4294965248 }
  0x16   :  { %755 = dma.done.wait [#allocation9], 2176  }
  0x17   :  { %756 = vsyncadd [#allocation9], 4294965120  ;;  %v568_v0 = vld [vmem:[#allocation5 + $0x38] sm:$0xff]  ;;  %v567_v1 = vld [vmem:[#allocation5 + $0x30] sm:$0xff]  ;;  %s421_s26 = sshll.u32 %s835_s6, 4  ;;  %s422_s26 = int_to_ptr.hbm [resolvable:$true] %s421_s26 }
  0x18   :  { %166 = vmatpush.bf16.msra.mxu0 %v568_v0  ;;  %v576_v2 = vld [vmem:[#allocation7 + $0x38] sm:$0xff]  ;;  %v575_v3 = vld [vmem:[#allocation7 + $0x30] sm:$0xff]  ;;  %v566_v4 = vld [vmem:[#allocation5 + $0x28] sm:$0xff] }
  0x19   :  { %247 = vmatpush.bf16.msra.mxu1 %v576_v2  ;;  %v574_v5 = vld [vmem:[#allocation7 + $0x28] sm:$0xff]  ;;  %v565_v6 = vld [vmem:[#allocation5 + $0x20] sm:$0xff]  ;;  %v564_v8 = vld [vmem:[#allocation5 + $0x18] sm:$0xff] }
  0x1a   :  { %v573_v7 = vld [vmem:[#allocation7 + $0x20] sm:$0xff]  ;;  %v572_v9 = vld [vmem:[#allocation7 + $0x18] sm:$0xff]  ;;  %v563_v10 = vld [vmem:[#allocation5 + $0x10] sm:$0xff] }
  0x1b   :  { %v571_v11 = vld [vmem:[#allocation7 + $0x10] sm:$0xff]  ;;  %v562_v12 = vld [vmem:[#allocation5 + $0x8] sm:$0xff]  ;;  %v561_v13 = vld [vmem:[#allocation5] sm:$0xff] }
  0x1c   :  { %167 = vmatpush.bf16.msra.mxu0 %v567_v1  ;;  %v100_v14 = vld [vmem:[#allocation2] sm:$0x1]  ;;  %v570_v15 = vld [vmem:[#allocation7 + $0x8] sm:$0xff]  ;;  %v569_v16 = vld [vmem:[#allocation7] sm:$0xff] }
  0x1d   :  { %248 = vmatpush.bf16.msra.mxu1 %v575_v3  ;;  %v822_v17 = vld [vmem:[%s834_s5] sm:$0xf]  ;;  %v592_v19 = vld [vmem:[#allocation8 + $0x74] sm:$0xf0]  ;;  %v591_v20 = vld [vmem:[#allocation8 + $0x74] sm:$0xf] }
  0x1e   :  { %406 = vst [vmem:[#allocation1] ss:$4 sm:$0xff] %v822_v17  ;;  %v555_v18 = vld [vmem:[#allocation8 + $0x70] sm:$0xf]  ;;  %v557_v22 = vld [vmem:[#allocation8 + $0x78] sm:$0xf0] }
  0x1f   :  { %v556_v21 = vor.u32 %v592_v19, %v555_v18  ;;  %v547_v23 = vld [vmem:[#allocation8 + $0x60] sm:$0xf]  ;;  %v590_v24 = vld [vmem:[#allocation8 + $0x64] sm:$0xf0]  ;;  %v560_v25 = vor.u32 %v591_v20, %v557_v22  ;;  %v589_v26 = vld [vmem:[#allocation8 + $0x64] sm:$0xf] }
  0x20   :  { %168 = vmatpush.bf16.msra.mxu0 %v566_v4  ;;  %v549_v27 = vld [vmem:[#allocation8 + $0x68] sm:$0xf0]  ;;  %v548_v28 = vor.u32 %v590_v24, %v547_v23  ;;  %v539_v30 = vld [vmem:[#allocation8 + $0x50] sm:$0xf]  ;;  %v588_v31 = vld [vmem:[#allocation8 + $0x54] sm:$0xf0] }
  0x21   :  { %249 = vmatpush.bf16.msra.mxu1 %v574_v5  ;;  %364 = vmatpush.bf16.msra.mxu2 %v556_v21  ;;  %v552_v29 = vor.u32 %v589_v26, %v549_v27  ;;  %v587_v32 = vld [vmem:[#allocation8 + $0x54] sm:$0xf]  ;;  %v541_v33 = vld [vmem:[#allocation8 + $0x58] sm:$0xf0]  ;;  %v540_v34 = vor.u32 %v588_v31, %v539_v30  ;;  %v531_v36 = vld [vmem:[#allocation8 + $0x40] sm:$0xf] }
  0x22   :  { %377 = vmatpush.bf16.msra.mxu3 %v560_v25  ;;  %v544_v35 = vor.u32 %v587_v32, %v541_v33  ;;  %v586_v37 = vld [vmem:[#allocation8 + $0x44] sm:$0xf0]  ;;  %v585_v38 = vld [vmem:[#allocation8 + $0x44] sm:$0xf]  ;;  %v533_v39 = vld [vmem:[#allocation8 + $0x48] sm:$0xf0] }
  0x23   :  { %v532_v40 = vor.u32 %v586_v37, %v531_v36  ;;  %v536_v41 = vor.u32 %v585_v38, %v533_v39  ;;  %v523_v42 = vld [vmem:[#allocation8 + $0x30] sm:$0xf]  ;;  %v584_v43 = vld [vmem:[#allocation8 + $0x34] sm:$0xf0]  ;;  %v583_v44 = vld [vmem:[#allocation8 + $0x34] sm:$0xf] }
  0x24   :  { %169 = vmatpush.bf16.msra.mxu0 %v565_v6  ;;  %v525_v45 = vld [vmem:[#allocation8 + $0x38] sm:$0xf0]  ;;  %v524_v46 = vor.u32 %v584_v43, %v523_v42  ;;  %v515_v48 = vld [vmem:[#allocation8 + $0x20] sm:$0xf]  ;;  %v582_v49 = vld [vmem:[#allocation8 + $0x24] sm:$0xf0] }
  0x25   :  { %250 = vmatpush.bf16.msra.mxu1 %v573_v7  ;;  %365 = vmatpush.bf16.msra.mxu2 %v548_v28  ;;  %v528_v47 = vor.u32 %v583_v44, %v525_v45  ;;  %v98_v50 = vld [vmem:[#allocation10] sm:$0x77]  ;;  %v517_v52 = vld [vmem:[#allocation8 + $0x28] sm:$0xf0]  ;;  %v516_v53 = vor.u32 %v582_v49, %v515_v48  ;;  %v507_v56 = vld [vmem:[#allocation8 + $0x10] sm:$0xf] }
  0x26   :  { %378 = vmatpush.bf16.msra.mxu3 %v552_v29  ;;  %v581_v51 = vld [vmem:[#allocation8 + $0x24] sm:$0xf]  ;;  %v117_v54 = vperm.slane %v98_v50, 0  ;;  %v580_v57 = vld [vmem:[#allocation8 + $0x14] sm:$0xf0]  ;;  %s768_s5 = smov [#allocation11]  }
  0x27   :  { %v520_v55 = vor.u32 %v581_v51, %v517_v52  ;;  %v579_v58 = vld [vmem:[#allocation8 + $0x14] sm:$0xf]  ;;  %v509_v59 = vld [vmem:[#allocation8 + $0x18] sm:$0xf0]  ;;  %v508_v61 = vor.u32 %v580_v57, %v507_v56  ;;  %v499_v4 = vld [vmem:[#allocation8] sm:$0xf] }
  0x28   :  { %170 = vmatpush.bf16.msra.mxu0 %v564_v8  ;;  %v512_v63 = vor.u32 %v579_v58, %v509_v59  ;;  %v578_v5 = vld [vmem:[#allocation8 + $0x4] sm:$0xf0]  ;;  %v577_v6 = vld [vmem:[#allocation8 + $0x4] sm:$0xf]  ;;  %v501_v8 = vld [vmem:[#allocation8 + $0x8] sm:$0xf0] }
  0x29   :  { %251 = vmatpush.bf16.msra.mxu1 %v572_v9  ;;  %366 = vmatpush.bf16.msra.mxu2 %v540_v34  ;;  %v500_v7 = vor.u32 %v578_v5, %v499_v4  ;;  %v504_v9 = vor.u32 %v577_v6, %v501_v8  ;;  %v407_v38 = vld.sshfl [vmem:[#allocation1 + $0x8] sm:$0xff pattern:$0x73625140]  ;;  %s419_s23 = sshll.u32 %s768_s5, 4  ;;  %s420_s23 = int_to_ptr.vmem [resolvable:$true] %s419_s23 }
  0x2a   :  { %379 = vmatpush.bf16.msra.mxu3 %v544_v35 }
  0x2c   :  { %171 = vmatpush.bf16.msra.mxu0 %v563_v10  ;;  %v198_v10 = vperm.slane %v98_v50, 1 }
  0x2d   :  { %252 = vmatpush.bf16.msra.mxu1 %v571_v11  ;;  %367 = vmatpush.bf16.msra.mxu2 %v532_v40 }
  0x2e   :  { %380 = vmatpush.bf16.msra.mxu3 %v536_v41 }
  0x30   :  { %172 = vmatpush.bf16.msra.mxu0 %v562_v12 }
  0x31   :  { %253 = vmatpush.bf16.msra.mxu1 %v570_v15  ;;  %368 = vmatpush.bf16.msra.mxu2 %v524_v46  ;;  %v278_v15 = vperm.slane %v98_v50, 2 }
  0x32   :  { %381 = vmatpush.bf16.msra.mxu3 %v528_v47 }
  0x34   :  { %173 = vmatpush.bf16.msra.mxu0 %v561_v13 }
  0x35   :  { %254 = vmatpush.bf16.msra.mxu1 %v569_v16  ;;  %369 = vmatpush.bf16.msra.mxu2 %v516_v53  ;;  %v279_v16 = vperm.slane %v98_v50, 6 }
  0x36   :  { %382 = vmatpush.bf16.msra.mxu3 %v520_v55 }
  0x37   :  { %174 = vmatmul.bf16.vlgmr.msra.gmra.mxu0 %v100_v14  ;;  %v283_v18 = vperm.slane %v279_v16, 2 }
  0x39   :  { %370 = vmatpush.bf16.msra.mxu2 %v508_v61 }
  0x3a   :  { %383 = vmatpush.bf16.msra.mxu3 %v512_v63 }
  0x3d   :  { %371 = vmatpush.bf16.msra.mxu2 %v500_v7 }
  0x3e   :  { %384 = vmatpush.bf16.msra.mxu3 %v504_v9 }
  0xb4   :  { %v175_v60 = vpop.f32.mrf.mxu0 }
  0xb5   :  { %v176_v62 = vadd.f32 %v175_v60, %v117_v54 }
  0xb7   :  { %v179_v0 = vmax.f32 %v176_v62, 0.0 }
  0xb9   :  { %v180_v1 = vmul.f32 %v179_v0, %v822_v17  ;;  %v282_v17 = vperm.slane %v278_v15, 2 }
  0xbb   :  { %v181_v2 = vpack.c.bf16 %v180_v1, %v180_v1 }
  0xbc   :  { %v177_v3 = vpop.f32.mrf.mxu0 }
  0xbd   :  { %255 = vmatmul.bf16.vlgmr.msra.gmra.mxu1 %v181_v2 }
 0x13a   :  { %v256_v11 = vpop.f32.mrf.mxu1 }
 0x13b   :  { %v257_v12 = vadd.f32 %v256_v11, %v198_v10 }
 0x13d   :  { %v260_v13 = vpack.c.bf16 %v257_v12, %v257_v12 }
 0x13f   :  { %372 = vmatmul.bf16.vlgmr.msra.gmra.mxu2 %v260_v13  ;;  %385 = vmatmul.bf16.vlgmr.msra.gmra.mxu3 %v260_v13 }
 0x142   :  { %v258_v14 = vpop.f32.mrf.mxu1 }
 0x1c2   :  { %v373_v19 = vpop.f32.mrf.mxu2  ;;  %v386_v20 = vpop.f32.mrf.mxu3 }
 0x1c3   :  { %v374_v21 = vadd.f32 %v373_v19, %v282_v17  ;;  %v387_v22 = vadd.f32 %v386_v20, %v283_v18 }
 0x1c5   :  { %412 = vst [vmem:[#allocation11 + $0x2] sm:$0x3] %v374_v21  ;;  %v391_v23 = vand.u32 2147483647, %v387_v22  ;;  %v390_v36 = vmax.f32 %v387_v22, 0.0 }
 0x1c7   :  { %v392_v24 = vsub.f32 0.0, %v391_v23 }
 0x1c9   :  { %v393_v25 = vmul.f32 1.442695, %v392_v24 }
 0x1ca   :  { %v375_v26 = vpop.f32.mrf.mxu2  ;;  %v388_v27 = vpop.f32.mrf.mxu3 }
 0x1cb   :  { %603 = vpow2.f32 %v393_v25 }
 0x1d1   :  { %v604_v28 = vpop.eup %603 }
 0x1d2   :  { %v395_v29 = vadd.f32 1.0, %v604_v28  ;;  %v398_v30 = vmul.f32 -0.5, %v604_v28  ;;  %v401_v32 = vand.u32 2147483647, %v604_v28 }
 0x1d4   :  { %605 = vlog2.f32 %v395_v29  ;;  %v399_v31 = vadd.f32 1.0, %v398_v30  ;;  %vm402_vm0 = vcmp.lt.f32.partialorder %v401_v32, 0.0004427343 }
 0x1d6   :  { %v400_v35 = vmul.f32 %v604_v28, %v399_v31 }
 0x1da   :  { %v606_v33 = vpop.eup %605 }
 0x1db   :  { %v397_v34 = vmul.f32 0.6931472, %v606_v33 }
 0x1dd   :  { %v403_v37 = vsel %vm402_vm0, %v400_v35, %v397_v34 }
 0x1de   :  { %v404_v39 = vadd.f32 %v403_v37, %v390_v36 }
 0x1e0   :  { %v409_v40 = vmul.f32 %v407_v38, %v404_v39  ;;  %413 = vst [vmem:[#allocation11 + $0x4] sm:$0x3] %v404_v39 }
 0x1e2   :  { %v410_v41 = vadd.f32 %v409_v40, %v374_v21 }
 0x1e4   :  { %411 = vst [vmem:[#allocation11] sm:$0x3] %v410_v41 }
 0x1e5   :  { %424 = dma.vmem_to_hbm [thread:$0]  %s420_s23, 96, %s422_s26, [#allocation4]  }
 0x1e6   :  { %757 = dma.done.wait [#allocation4], 96  }
 0x1e7   :  { %758 = vsyncadd [#allocation4], 4294967200 }
 0x1e8   :  { %429 = vsyncpa [#allocation3], 1 }
 0x1e9   :  { %430 = vsyncpa [#allocation6], 1 }
 0x1ea   :  { %431 = vsyncpa [#allocation9], 1 }
 0x1eb   :  { %432 = vsyncpa [#allocation4], 1 }

// kernel: tpu_custom_call.1
= control target key start
LH: loop header
LB: loop body
LE: loop exit
PB: predicated region body
PF: predicated region fallthrough
CT: control target
= control target key end

     0   :  { %11 = vsyncpa [#allocation3], 0  ;;  %s829_s0 = inlined_call_operand.hbm [shape: bf16[2,128], index: 0, kind: input, shape index: {}]   ;;  %s830_s1 = inlined_call_operand.hbm [shape: bf16[128,128], index: 1, kind: input, shape index: {}]   ;;  %s831_s2 = inlined_call_operand.hbm [shape: bf16[128,128], index: 2, kind: input, shape index: {}]   ;;  %s832_s3 = inlined_call_operand.hbm [shape: bf16[128,256], index: 3, kind: input, shape index: {}]   ;;  %s833_s4 = inlined_call_operand.hbm [shape: f32[3,256], index: 4, kind: input, shape index: {}]   ;;  %s834_s5 = inlined_call_operand.vmem [shape: f32[2,256], index: 5, kind: input, shape index: {}]   ;;  %s835_s6 = inlined_call_operand.hbm [shape: f32[2,384], index: 6, kind: output, shape index: {}]  }
   0x1   :  { %12 = vsyncpa [#allocation6], 0 }
   0x2   :  { %13 = vsyncpa [#allocation9], 0  ;;  %s30_s23 = sshll.u32 %s830_s1, 4  ;;  %s31_s23 = int_to_ptr.hbm [resolvable:$true] %s30_s23 }
   0x3   :  { %14 = vsyncpa [#allocation4], 0  ;;  %s759_s24 = smov [#allocation5]   ;;  %s56_s28 = sshll.u32 %s832_s3, 4  ;;  %s57_s28 = int_to_ptr.hbm [resolvable:$true] %s56_s28 }
   0x4   :  { %s32_s25 = sshll.u32 %s759_s24, 4  ;;  %s760_s29 = smov 64   ;;  %s33_s25 = int_to_ptr.vmem [resolvable:$true] %s32_s25 }
   0x5   :  { %s761_s30 = smov 4   ;;  %s762_s7 = smov [#allocation8]  }
   0x6   :  { %38 = dma.hbm_to_vmem [thread:$0]  %s31_s23, 1024, %s33_s25, [#allocation6], %s760_s29, %s760_s29, %s761_s30  }
   0x7   :  { %s58_s8 = sshll.u32 %s762_s7, 4  ;;  %s763_s9 = smov 128   ;;  %s59_s8 = int_to_ptr.vmem [resolvable:$true] %s58_s8 }
   0x8   :  { %s764_s10 = smov 8   ;;  %s20_s12 = sshll.u32 %s829_s0, 4  ;;  %s21_s12 = int_to_ptr.hbm [resolvable:$true] %s20_s12 }
   0x9   :  { %64 = dma.hbm_to_vmem [thread:$0]  %s57_s28, 2048, %s59_s8, [#allocation9], %s763_s9, %s763_s9, %s764_s10  }
   0xa   :  { %s765_s13 = smov [#allocation2]   ;;  %s43_s16 = sshll.u32 %s831_s2, 4  ;;  %s44_s16 = int_to_ptr.hbm [resolvable:$true] %s43_s16 }
   0xb   :  { %s22_s14 = sshll.u32 %s765_s13, 4  ;;  %s766_s17 = smov [#allocation7]   ;;  %s23_s14 = int_to_ptr.vmem [resolvable:$true] %s22_s14 }
   0xc   :  { %25 = dma.hbm_to_vmem [thread:$0]  %s21_s12, 16, %s23_s14, [#allocation3]  }
   0xd   :  { %s45_s18 = sshll.u32 %s766_s17, 4  ;;  %s70_s21 = sshll.u32 %s833_s4, 4  ;;  %s46_s18 = int_to_ptr.vmem [resolvable:$true] %s45_s18  ;;  %s71_s21 = int_to_ptr.hbm [resolvable:$true] %s70_s21 }
   0xe   :  { %51 = dma.hbm_to_vmem [thread:$0]  %s44_s16, 1024, %s46_s18, [#allocation6], %s760_s29, %s760_s29, %s761_s30  }
   0xf   :  { %s767_s0 = smov [#allocation10]  }
  0x10   :  { %s72_s22 = sshll.u32 %s767_s0, 4  ;;  %s73_s22 = int_to_ptr.vmem [resolvable:$true] %s72_s22 }
  0x11   :  { %75 = dma.hbm_to_vmem [thread:$0]  %s71_s21, 128, %s73_s22, [#allocation9]  }
  0x12   :  { %751 = dma.done.wait [#allocation3], 16  }
  0x13   :  { %752 = vsyncadd [#allocation3], 4294967280 }
  0x14   :  { %753 = dma.done.wait [#allocation6], 2048  }
  0x15   :  { %754 = vsyncadd [#allocation6], 4294965248 }
  0x16   :  { %755 = dma.done.wait [#allocation9], 2176  }
  0x17   :  { %756 = vsyncadd [#allocation9], 4294965120  ;;  %v568_v0 = vld [vmem:[#allocation5 + $0x38] sm:$0xff]  ;;  %v567_v1 = vld [vmem:[#allocation5 + $0x30] sm:$0xff]  ;;  %s421_s26 = sshll.u32 %s835_s6, 4  ;;  %s422_s26 = int_to_ptr.hbm [resolvable:$true] %s421_s26 }
  0x18   :  { %166 = vmatpush.bf16.msra.mxu0 %v568_v0  ;;  %v576_v2 = vld [vmem:[#allocation7 + $0x38] sm:$0xff]  ;;  %v575_v3 = vld [vmem:[#allocation7 + $0x30] sm:$0xff]  ;;  %v566_v4 = vld [vmem:[#allocation5 + $0x28] sm:$0xff] }
  0x19   :  { %247 = vmatpush.bf16.msra.mxu1 %v576_v2  ;;  %v574_v5 = vld [vmem:[#allocation7 + $0x28] sm:$0xff]  ;;  %v565_v6 = vld [vmem:[#allocation5 + $0x20] sm:$0xff]  ;;  %v564_v8 = vld [vmem:[#allocation5 + $0x18] sm:$0xff] }
  0x1a   :  { %v573_v7 = vld [vmem:[#allocation7 + $0x20] sm:$0xff]  ;;  %v572_v9 = vld [vmem:[#allocation7 + $0x18] sm:$0xff]  ;;  %v563_v10 = vld [vmem:[#allocation5 + $0x10] sm:$0xff] }
  0x1b   :  { %v571_v11 = vld [vmem:[#allocation7 + $0x10] sm:$0xff]  ;;  %v562_v12 = vld [vmem:[#allocation5 + $0x8] sm:$0xff]  ;;  %v561_v13 = vld [vmem:[#allocation5] sm:$0xff] }
  0x1c   :  { %167 = vmatpush.bf16.msra.mxu0 %v567_v1  ;;  %v100_v14 = vld [vmem:[#allocation2] sm:$0x1]  ;;  %v570_v15 = vld [vmem:[#allocation7 + $0x8] sm:$0xff]  ;;  %v569_v16 = vld [vmem:[#allocation7] sm:$0xff] }
  0x1d   :  { %248 = vmatpush.bf16.msra.mxu1 %v575_v3  ;;  %v822_v17 = vld [vmem:[%s834_s5] sm:$0xf]  ;;  %v592_v19 = vld [vmem:[#allocation8 + $0x74] sm:$0xf0]  ;;  %v591_v20 = vld [vmem:[#allocation8 + $0x74] sm:$0xf] }
  0x1e   :  { %406 = vst [vmem:[#allocation1] ss:$4 sm:$0xff] %v822_v17  ;;  %v555_v18 = vld [vmem:[#allocation8 + $0x70] sm:$0xf]  ;;  %v557_v22 = vld [vmem:[#allocation8 + $0x78] sm:$0xf0] }
  0x1f   :  { %v556_v21 = vor.u32 %v592_v19, %v555_v18  ;;  %v547_v23 = vld [vmem:[#allocation8 + $0x60] sm:$0xf]  ;;  %v590_v24 = vld [vmem:[#allocation8 + $0x64] sm:$0xf0]  ;;  %v560_v25 = vor.u32 %v591_v20, %v557_v22  ;;  %v589_v26 = vld [vmem:[#allocation8 + $0x64] sm:$0xf] }
  0x20   :  { %168 = vmatpush.bf16.msra.mxu0 %v566_v4  ;;  %v549_v27 = vld [vmem:[#allocation8 + $0x68] sm:$0xf0]  ;;  %v548_v28 = vor.u32 %v590_v24, %v547_v23  ;;  %v539_v30 = vld [vmem:[#allocation8 + $0x50] sm:$0xf]  ;;  %v588_v31 = vld [vmem:[#allocation8 + $0x54] sm:$0xf0] }
  0x21   :  { %249 = vmatpush.bf16.msra.mxu1 %v574_v5  ;;  %364 = vmatpush.bf16.msra.mxu2 %v556_v21  ;;  %v552_v29 = vor.u32 %v589_v26, %v549_v27  ;;  %v587_v32 = vld [vmem:[#allocation8 + $0x54] sm:$0xf]  ;;  %v541_v33 = vld [vmem:[#allocation8 + $0x58] sm:$0xf0]  ;;  %v540_v34 = vor.u32 %v588_v31, %v539_v30  ;;  %v531_v36 = vld [vmem:[#allocation8 + $0x40] sm:$0xf] }
  0x22   :  { %377 = vmatpush.bf16.msra.mxu3 %v560_v25  ;;  %v544_v35 = vor.u32 %v587_v32, %v541_v33  ;;  %v586_v37 = vld [vmem:[#allocation8 + $0x44] sm:$0xf0]  ;;  %v585_v38 = vld [vmem:[#allocation8 + $0x44] sm:$0xf]  ;;  %v533_v39 = vld [vmem:[#allocation8 + $0x48] sm:$0xf0] }
  0x23   :  { %v532_v40 = vor.u32 %v586_v37, %v531_v36  ;;  %v536_v41 = vor.u32 %v585_v38, %v533_v39  ;;  %v523_v42 = vld [vmem:[#allocation8 + $0x30] sm:$0xf]  ;;  %v584_v43 = vld [vmem:[#allocation8 + $0x34] sm:$0xf0]  ;;  %v583_v44 = vld [vmem:[#allocation8 + $0x34] sm:$0xf] }
  0x24   :  { %169 = vmatpush.bf16.msra.mxu0 %v565_v6  ;;  %v525_v45 = vld [vmem:[#allocation8 + $0x38] sm:$0xf0]  ;;  %v524_v46 = vor.u32 %v584_v43, %v523_v42  ;;  %v515_v48 = vld [vmem:[#allocation8 + $0x20] sm:$0xf]  ;;  %v582_v49 = vld [vmem:[#allocation8 + $0x24] sm:$0xf0] }
  0x25   :  { %250 = vmatpush.bf16.msra.mxu1 %v573_v7  ;;  %365 = vmatpush.bf16.msra.mxu2 %v548_v28  ;;  %v528_v47 = vor.u32 %v583_v44, %v525_v45  ;;  %v98_v50 = vld [vmem:[#allocation10] sm:$0x77]  ;;  %v517_v52 = vld [vmem:[#allocation8 + $0x28] sm:$0xf0]  ;;  %v516_v53 = vor.u32 %v582_v49, %v515_v48  ;;  %v507_v56 = vld [vmem:[#allocation8 + $0x10] sm:$0xf] }
  0x26   :  { %378 = vmatpush.bf16.msra.mxu3 %v552_v29  ;;  %v581_v51 = vld [vmem:[#allocation8 + $0x24] sm:$0xf]  ;;  %v117_v54 = vperm.slane %v98_v50, 0  ;;  %v580_v57 = vld [vmem:[#allocation8 + $0x14] sm:$0xf0]  ;;  %s768_s5 = smov [#allocation11]  }
  0x27   :  { %v520_v55 = vor.u32 %v581_v51, %v517_v52  ;;  %v579_v58 = vld [vmem:[#allocation8 + $0x14] sm:$0xf]  ;;  %v509_v59 = vld [vmem:[#allocation8 + $0x18] sm:$0xf0]  ;;  %v508_v61 = vor.u32 %v580_v57, %v507_v56  ;;  %v499_v4 = vld [vmem:[#allocation8] sm:$0xf] }
  0x28   :  { %170 = vmatpush.bf16.msra.mxu0 %v564_v8  ;;  %v512_v63 = vor.u32 %v579_v58, %v509_v59  ;;  %v578_v5 = vld [vmem:[#allocation8 + $0x4] sm:$0xf0]  ;;  %v577_v6 = vld [vmem:[#allocation8 + $0x4] sm:$0xf]  ;;  %v501_v8 = vld [vmem:[#allocation8 + $0x8] sm:$0xf0] }
  0x29   :  { %251 = vmatpush.bf16.msra.mxu1 %v572_v9  ;;  %366 = vmatpush.bf16.msra.mxu2 %v540_v34  ;;  %v500_v7 = vor.u32 %v578_v5, %v499_v4  ;;  %v504_v9 = vor.u32 %v577_v6, %v501_v8  ;;  %v407_v38 = vld.sshfl [vmem:[#allocation1 + $0x8] sm:$0xff pattern:$0x73625140]  ;;  %s419_s23 = sshll.u32 %s768_s5, 4  ;;  %s420_s23 = int_to_ptr.vmem [resolvable:$true] %s419_s23 }
  0x2a   :  { %379 = vmatpush.bf16.msra.mxu3 %v544_v35 }
  0x2c   :  { %171 = vmatpush.bf16.msra.mxu0 %v563_v10  ;;  %v198_v10 = vperm.slane %v98_v50, 1 }
  0x2d   :  { %252 = vmatpush.bf16.msra.mxu1 %v571_v11  ;;  %367 = vmatpush.bf16.msra.mxu2 %v532_v40 }
  0x2e   :  { %380 = vmatpush.bf16.msra.mxu3 %v536_v41 }
  0x30   :  { %172 = vmatpush.bf16.msra.mxu0 %v562_v12 }
  0x31   :  { %253 = vmatpush.bf16.msra.mxu1 %v570_v15  ;;  %368 = vmatpush.bf16.msra.mxu2 %v524_v46  ;;  %v278_v15 = vperm.slane %v98_v50, 2 }
  0x32   :  { %381 = vmatpush.bf16.msra.mxu3 %v528_v47 }
  0x34   :  { %173 = vmatpush.bf16.msra.mxu0 %v561_v13 }
  0x35   :  { %254 = vmatpush.bf16.msra.mxu1 %v569_v16  ;;  %369 = vmatpush.bf16.msra.mxu2 %v516_v53  ;;  %v279_v16 = vperm.slane %v98_v50, 6 }
  0x36   :  { %382 = vmatpush.bf16.msra.mxu3 %v520_v55 }
  0x37   :  { %174 = vmatmul.bf16.vlgmr.msra.gmra.mxu0 %v100_v14  ;;  %v283_v18 = vperm.slane %v279_v16, 2 }
  0x39   :  { %370 = vmatpush.bf16.msra.mxu2 %v508_v61 }
  0x3a   :  { %383 = vmatpush.bf16.msra.mxu3 %v512_v63 }
  0x3d   :  { %371 = vmatpush.bf16.msra.mxu2 %v500_v7 }
  0x3e   :  { %384 = vmatpush.bf16.msra.mxu3 %v504_v9 }
  0xb4   :  { %v175_v60 = vpop.f32.mrf.mxu0 }
  0xb5   :  { %v176_v62 = vadd.f32 %v175_v60, %v117_v54 }
  0xb7   :  { %v179_v0 = vmax.f32 %v176_v62, 0.0 }
  0xb9   :  { %v180_v1 = vmul.f32 %v179_v0, %v822_v17  ;;  %v282_v17 = vperm.slane %v278_v15, 2 }
  0xbb   :  { %v181_v2 = vpack.c.bf16 %v180_v1, %v180_v1 }
  0xbc   :  { %v177_v3 = vpop.f32.mrf.mxu0 }
  0xbd   :  { %255 = vmatmul.bf16.vlgmr.msra.gmra.mxu1 %v181_v2 }
 0x13a   :  { %v256_v11 = vpop.f32.mrf.mxu1 }
 0x13b   :  { %v257_v12 = vadd.f32 %v256_v11, %v198_v10 }
 0x13d   :  { %v260_v13 = vpack.c.bf16 %v257_v12, %v257_v12 }
 0x13f   :  { %372 = vmatmul.bf16.vlgmr.msra.gmra.mxu2 %v260_v13  ;;  %385 = vmatmul.bf16.vlgmr.msra.gmra.mxu3 %v260_v13 }
 0x142   :  { %v258_v14 = vpop.f32.mrf.mxu1 }
 0x1c2   :  { %v373_v19 = vpop.f32.mrf.mxu2  ;;  %v386_v20 = vpop.f32.mrf.mxu3 }
 0x1c3   :  { %v374_v21 = vadd.f32 %v373_v19, %v282_v17  ;;  %v387_v22 = vadd.f32 %v386_v20, %v283_v18 }
 0x1c5   :  { %412 = vst [vmem:[#allocation11 + $0x2] sm:$0x3] %v374_v21  ;;  %v391_v23 = vand.u32 2147483647, %v387_v22  ;;  %v390_v36 = vmax.f32 %v387_v22, 0.0 }
 0x1c7   :  { %v392_v24 = vsub.f32 0.0, %v391_v23 }
 0x1c9   :  { %v393_v25 = vmul.f32 1.442695, %v392_v24 }
 0x1ca   :  { %v375_v26 = vpop.f32.mrf.mxu2  ;;  %v388_v27 = vpop.f32.mrf.mxu3 }
 0x1cb   :  { %603 = vpow2.f32 %v393_v25 }
 0x1d1   :  { %v604_v28 = vpop.eup %603 }
 0x1d2   :  { %v395_v29 = vadd.f32 1.0, %v604_v28  ;;  %v398_v30 = vmul.f32 -0.5, %v604_v28  ;;  %v401_v32 = vand.u32 2147483647, %v604_v28 }
 0x1d4   :  { %605 = vlog2.f32 %v395_v29  ;;  %v399_v31 = vadd.f32 1.0, %v398_v30  ;;  %vm402_vm0 = vcmp.lt.f32.partialorder %v401_v32, 0.0004427343 }
 0x1d6   :  { %v400_v35 = vmul.f32 %v604_v28, %v399_v31 }
 0x1da   :  { %v606_v33 = vpop.eup %605 }
 0x1db   :  { %v397_v34 = vmul.f32 0.6931472, %v606_v33 }
 0x1dd   :  { %v403_v37 = vsel %vm402_vm0, %v400_v35, %v397_v34 }
 0x1de   :  { %v404_v39 = vadd.f32 %v403_v37, %v390_v36 }
 0x1e0   :  { %v409_v40 = vmul.f32 %v407_v38, %v404_v39  ;;  %413 = vst [vmem:[#allocation11 + $0x4] sm:$0x3] %v404_v39 }
 0x1e2   :  { %v410_v41 = vadd.f32 %v409_v40, %v374_v21 }
 0x1e4   :  { %411 = vst [vmem:[#allocation11] sm:$0x3] %v410_v41 }
 0x1e5   :  { %424 = dma.vmem_to_hbm [thread:$0]  %s420_s23, 96, %s422_s26, [#allocation4]  }
 0x1e6   :  { %757 = dma.done.wait [#allocation4], 96  }
 0x1e7   :  { %758 = vsyncadd [#allocation4], 4294967200 }
 0x1e8   :  { %429 = vsyncpa [#allocation3], 1 }
 0x1e9   :  { %430 = vsyncpa [#allocation6], 1 }
 0x1ea   :  { %431 = vsyncpa [#allocation9], 1 }
 0x1eb   :  { %432 = vsyncpa [#allocation4], 1 }

</bundles_post_ra>
